<compile_context>
chip_gen: v7x
topology: tpu7x:2x2x1
jax: 0.10.0
libtpu: 0.0.40
codegen_flags: <defaults>
</compile_context>

<pallas_src>
import functools

import jax
import jax.numpy as jnp
from jax import lax
from jax.experimental import pallas as pl
from jax.experimental.pallas import tpu as pltpu


# ------------------------------ helpers -------------------------------------


def _cdiv(a, b):
    return -(-a // b)


def _round_up(a, m):
    return _cdiv(a, m) * m


def _vmem_capacity_bytes():
    """Physical VMEM per TensorCore; generation-aware fallback (not 64 MiB)."""
    try:
        cap = int(pltpu.get_tpu_info().vmem_capacity_bytes)
        if cap > 0:
            return cap
    except Exception:
        pass
    try:
        kind = jax.devices()[0].device_kind.lower()
    except Exception:
        kind = ""
    return (64 << 20) if "v7" in kind else (128 << 20)


_BUDGET_FRAC = 0.65   # fraction of physical VMEM used to size blocks
_LIMIT_FRAC = 0.75    # cap for vmem_limit_bytes (v7x: ~48 MiB of 64 MiB)


def _choose_tile(n, cap_elems, granularity, min_steps=1):
    """Tile along one independent axis.

    A block dim must be a multiple of `granularity` (8 sublanes / 128 lanes)
    or equal the full axis.  Blocks are balanced over the minimal number of
    grid steps that fits the VMEM budget; a ragged last block is fine because
    every column is normalized independently and OOB stores are masked.
    """
    if n <= granularity:
        return n
    cap = max(granularity, (int(cap_elems) // granularity) * granularity)
    if n <= cap and min_steps <= 1:
        return n
    steps = max(_cdiv(n, cap), min_steps)
    return min(cap, _round_up(_cdiv(n, steps), granularity))


# --------------------- path A: lane-dense (C*F, B*T) ------------------------


def _ln_cf_2d_kernel(x_ref, gb_ref, o_ref, *, eps, inv_n):
    # x_ref/o_ref: (CF, TILE) -- reduction axis (C*F) on sublanes (XLU reduce),
    # large independent (B*T) axis on the 128-wide lane axis (lane-dense I/O).
    # gb_ref: (CF, 2) = gamma | beta packed into a single block.
    x = x_ref[...].astype(jnp.float32)
    mu = jnp.sum(x, axis=0, keepdims=True) * inv_n               # (1, TILE)
    d = x - mu
    # Two-pass variance: no catastrophic cancellation when |mean| >> std.
    var = jnp.sum(d * d, axis=0, keepdims=True) * inv_n
    inv_std = lax.rsqrt(var + eps)                               # EUP slot
    gb = gb_ref[...]
    g = gb[:, 0:1]                                               # (CF, 1)
    b = gb[:, 1:2]
    o_ref[...] = ((d * inv_std) * g + b).astype(o_ref.dtype)


def _ln_cf_2d(x2d, gb, eps):
    """x2d: (C*F, B*T); gb: (C*F, 2) fp32 (gamma, beta)."""
    CF, BT = x2d.shape
    itemsize = jnp.dtype(x2d.dtype).itemsize

    vmem = _vmem_capacity_bytes()
    budget = int(_BUDGET_FRAC * vmem)
    # Per-lane bytes: 2 double-buffered input + 2 output blocks + ~3 full-tile
    # fp32 temporaries the compiler keeps live between the passes.
    per_lane = CF * (4 * itemsize + 3 * 4)
    # Fixed: the (CF, 2) param block lane-pads to 128 -> CF*512 B per pipeline
    # buffer (x2), plus a safety margin for compiler-internal scratch.
    fixed = 2 * CF * 128 * 4 + (2 << 20)
    cap_lanes = max((budget - fixed) // per_lane, 128)
    min_steps = 2 if BT >= 1024 else 1        # let "parallel" shard over 2 TCs
    tile = _choose_tile(BT, cap_lanes, 128, min_steps)
    grid = (_cdiv(BT, tile),)

    est = fixed + per_lane * tile
    vmem_limit = int(min(_LIMIT_FRAC * vmem, max(32 << 20, int(1.5 * est))))

    cost = pl.CostEstimate(
        flops=7 * CF * BT,
        transcendentals=BT,
        bytes_accessed=2 * CF * BT * itemsize + CF * 2 * 4,
    )

    kernel = functools.partial(_ln_cf_2d_kernel, eps=float(eps), inv_n=1.0 / CF)
    return pl.pallas_call(
        kernel,
        out_shape=jax.ShapeDtypeStruct((CF, BT), x2d.dtype),
        grid_spec=pltpu.PrefetchScalarGridSpec(
            num_scalar_prefetch=0,
            grid=grid,
            in_specs=[
                pl.BlockSpec((CF, tile), lambda i: (0, i)),
                pl.BlockSpec((CF, 2), lambda i: (0, 0)),
            ],
            out_specs=pl.BlockSpec((CF, tile), lambda i: (0, i)),
        ),
        compiler_params=pltpu.CompilerParams(
            dimension_semantics=("parallel",),
            vmem_limit_bytes=vmem_limit,
        ),
        cost_estimate=cost,
    )(x2d, gb)


# ------------------- path B: native (B, C, T, F) layout ---------------------


def _ln_cf_native_kernel(x_ref, g_ref, b_ref, o_ref, *, eps, inv_n):
    # x_ref/o_ref: (C, TILE_T, F) -- B squeezed; lane axis = F (lane-dense),
    # sublane axis = TILE_T.  Stats are per t (per sublane).
    x = x_ref[...].astype(jnp.float32)
    s = jnp.sum(jnp.sum(x, axis=2, keepdims=True), axis=0, keepdims=True)
    mu = s * inv_n                                               # (1, TILE_T, 1)
    d = x - mu
    v = jnp.sum(jnp.sum(d * d, axis=2, keepdims=True), axis=0, keepdims=True)
    inv_std = lax.rsqrt(v * inv_n + eps)                         # EUP slot
    g = g_ref[...][:, None, :]                                   # (C, 1, F)
    b = b_ref[...][:, None, :]
    o_ref[...] = ((d * inv_std) * g + b).astype(o_ref.dtype)


def _ln_cf_native(x, gamma, beta, eps):
    B, C, T, F = x.shape
    CF = C * F
    itemsize = jnp.dtype(x.dtype).itemsize
    g2d = gamma.reshape(C, F).astype(jnp.float32)
    b2d = beta.reshape(C, F).astype(jnp.float32)

    vmem = _vmem_capacity_bytes()
    budget = int(_BUDGET_FRAC * vmem)
    per_t = CF * (4 * itemsize + 3 * 4)
    fixed = 2 * 2 * _round_up(C, 8) * F * 4 + (2 << 20)
    cap_t = max((budget - fixed) // per_t, 8)
    min_steps = 2 if (B == 1 and T >= 256) else 1
    tile_t = _choose_tile(T, cap_t, 8, min_steps)
    grid = (B, _cdiv(T, tile_t))

    est = fixed + per_t * tile_t
    vmem_limit = int(min(_LIMIT_FRAC * vmem, max(32 << 20, int(1.5 * est))))

    cost = pl.CostEstimate(
        flops=7 * B * CF * T,
        transcendentals=B * T,
        bytes_accessed=2 * B * CF * T * itemsize + 2 * CF * 4,
    )

    kernel = functools.partial(_ln_cf_native_kernel, eps=float(eps), inv_n=1.0 / CF)
    return pl.pallas_call(
        kernel,
        out_shape=jax.ShapeDtypeStruct((B, C, T, F), x.dtype),
        grid_spec=pltpu.PrefetchScalarGridSpec(
            num_scalar_prefetch=0,
            grid=grid,
            in_specs=[
                pl.BlockSpec((None, C, tile_t, F), lambda b, t: (b, 0, t, 0)),
                pl.BlockSpec((C, F), lambda b, t: (0, 0)),
                pl.BlockSpec((C, F), lambda b, t: (0, 0)),
            ],
            out_specs=pl.BlockSpec((None, C, tile_t, F), lambda b, t: (b, 0, t, 0)),
        ),
        compiler_params=pltpu.CompilerParams(
            dimension_semantics=("parallel", "parallel"),
            vmem_limit_bytes=vmem_limit,
        ),
        cost_estimate=cost,
    )(x, g2d, b2d)


# ------------------------------ public API -----------------------------------


def layer_normalization_4d_cf(x, gamma, beta, eps=1e-5):
    """_LayerNormalization4DCF forward. x: (B, C, T, F); gamma/beta: (1, C, 1, F)."""
    B, C, T, F = x.shape
    if F % 128 == 0:
        # Lane-dense F: normalize directly in the native layout -> no wrapper
        # transposes, pure 1R + 1W of HBM.
        return _ln_cf_native(x, gamma, beta, eps)
    # Small F: lane-dense (C*F, B*T) compute layout.  The two transposes below
    # are pure layout plumbing; callers that keep activations in (C, F, B, T)
    # layout should use layer_normalization_4d_cf_cfbt and skip them entirely.
    # TODO(synk): hoist this layout change upstream of the TFGridNet block.
    CF, BT = C * F, B * T
    x2d = jnp.transpose(x, (1, 3, 0, 2)).reshape(CF, BT)
    gb = jnp.concatenate(
        [gamma.reshape(CF, 1), beta.reshape(CF, 1)], axis=1).astype(jnp.float32)
    out2d = _ln_cf_2d(x2d, gb, eps)
    return jnp.transpose(out2d.reshape(C, F, B, T), (2, 0, 3, 1))


def layer_normalization_4d_cf_cfbt(x_cfbt, gamma, beta, eps=1e-5):
    """Transpose-free variant: x already in (C, F, B, T) layout (same layout out)."""
    C, F, B, T = x_cfbt.shape
    CF = C * F
    gb = jnp.concatenate(
        [gamma.reshape(CF, 1), beta.reshape(CF, 1)], axis=1).astype(jnp.float32)
    out2d = _ln_cf_2d(x_cfbt.reshape(CF, B * T), gb, eps)
    return out2d.reshape(C, F, B, T)


def _reference(x, gamma, beta, eps=1e-5):
    mu = jnp.mean(x, axis=(1, 3), keepdims=True)
    var = jnp.mean((x - mu) ** 2, axis=(1, 3), keepdims=True)
    return (x - mu) / jnp.sqrt(var + eps) * gamma + beta


if __name__ == "__main__":
    key = jax.random.PRNGKey(0)
    kx1, kx2, kg, kb = jax.random.split(key, 4)

    # Case 1: input_dimension = (C, F) = (4, 16) -> small-F (C*F, B*T) path.
    # DC offset exercises the two-pass variance.
    B, C, T, F = 2, 4, 16, 16
    x = 3.0 + 0.5 * jax.random.normal(kx1, (B, C, T, F), dtype=jnp.float32)
    gamma = (1.0 + 0.1 * jax.random.normal(kg, (1, C, 1, F))).astype(jnp.float32)
    beta = (0.1 * jax.random.normal(kb, (1, C, 1, F))).astype(jnp.float32)
    out = jax.block_until_ready(layer_normalization_4d_cf(x, gamma, beta))
    ref = _reference(x, gamma, beta)
    assert out.shape == (B, C, T, F)
    assert jnp.allclose(out, ref, atol=1e-4, rtol=1e-4), "small-F path mismatch"

    # Transpose-free entry point (caller keeps the (C, F, B, T) layout).
    out_cfbt = jax.block_until_ready(
        layer_normalization_4d_cf_cfbt(jnp.transpose(x, (1, 3, 0, 2)), gamma, beta))
    assert jnp.allclose(jnp.transpose(out_cfbt, (2, 0, 3, 1)), ref,
                        atol=1e-4, rtol=1e-4), "cfbt path mismatch"

    # Case 2: lane-dense F (=128) -> native-layout path (no wrapper transposes).
    B2, C2, T2, F2 = 2, 4, 16, 128
    x2 = jax.random.normal(kx2, (B2, C2, T2, F2), dtype=jnp.float32)
    gamma2 = (1.0 + 0.1 * jax.random.normal(kg, (1, C2, 1, F2))).astype(jnp.float32)
    beta2 = (0.1 * jax.random.normal(kb, (1, C2, 1, F2))).astype(jnp.float32)
    out2 = jax.block_until_ready(layer_normalization_4d_cf(x2, gamma2, beta2))
    ref2 = _reference(x2, gamma2, beta2)
    assert jnp.allclose(out2, ref2, atol=1e-4, rtol=1e-4), "native path mismatch"

    print("KERNEL_OK")
</pallas_src>

<mosaic_0001>
module attributes {stable_mosaic.version = 11 : i64} {
  func.func @_ln_cf_2d_kernel(%arg0: i32, %arg1: memref<64x32xf32, #tpu.memory_space<vmem>>, %arg2: memref<64x2xf32, #tpu.memory_space<vmem>>, %arg3: memref<64x32xf32, #tpu.memory_space<vmem>>) attributes {dimension_semantics = [#tpu.dimension_semantics<parallel>], iteration_bounds = array<i64: 1>, scalar_prefetch = 0 : i64, scratch_operands = 0 : i64, tpu.core_type = #tpu.core_type<tc>, window_params = [{transform_indices = @transform_0, window_bounds = array<i64: 64, 32>}, {pipeline_mode = #tpu.pipeline_mode<synchronous>, transform_indices = @transform_1, window_bounds = array<i64: 64, 2>}, {transform_indices = @transform_2, window_bounds = array<i64: 64, 32>}]} {
    %c0 = arith.constant 0 : index
    %c0_0 = arith.constant 0 : index
    %0 = vector.load %arg1[%c0, %c0_0] : memref<64x32xf32, #tpu.memory_space<vmem>>, vector<64x32xf32>
    %cst = arith.constant dense<0.000000e+00> : vector<32xf32>
    %1 = vector.multi_reduction <add>, %0, %cst [0] : vector<64x32xf32> to vector<32xf32>
    %2 = vector.shape_cast %1 : vector<32xf32> to vector<1x32xf32>
    %cst_1 = arith.constant 1.562500e-02 : f32
    %3 = vector.broadcast %cst_1 : f32 to vector<1x32xf32>
    %4 = arith.mulf %2, %3 : vector<1x32xf32>
    %5 = vector.broadcast %4 : vector<1x32xf32> to vector<64x32xf32>
    %6 = arith.subf %0, %5 : vector<64x32xf32>
    %7 = arith.mulf %6, %6 : vector<64x32xf32>
    %cst_2 = arith.constant dense<0.000000e+00> : vector<32xf32>
    %8 = vector.multi_reduction <add>, %7, %cst_2 [0] : vector<64x32xf32> to vector<32xf32>
    %9 = vector.shape_cast %8 : vector<32xf32> to vector<1x32xf32>
    %cst_3 = arith.constant 1.562500e-02 : f32
    %10 = vector.broadcast %cst_3 : f32 to vector<1x32xf32>
    %11 = arith.mulf %9, %10 : vector<1x32xf32>
    %cst_4 = arith.constant 9.99999974E-6 : f32
    %12 = vector.broadcast %cst_4 : f32 to vector<1x32xf32>
    %13 = arith.addf %11, %12 : vector<1x32xf32>
    %14 = math.rsqrt %13 : vector<1x32xf32>
    %c0_5 = arith.constant 0 : index
    %c0_6 = arith.constant 0 : index
    %15 = vector.load %arg2[%c0_5, %c0_6] : memref<64x2xf32, #tpu.memory_space<vmem>>, vector<64x2xf32>
    %16 = vector.extract_strided_slice %15 {offsets = [0, 0], sizes = [64, 1], strides = [1, 1]} : vector<64x2xf32> to vector<64x1xf32>
    %17 = vector.extract_strided_slice %15 {offsets = [0, 1], sizes = [64, 1], strides = [1, 1]} : vector<64x2xf32> to vector<64x1xf32>
    %18 = vector.broadcast %14 : vector<1x32xf32> to vector<64x32xf32>
    %19 = arith.mulf %6, %18 : vector<64x32xf32>
    %20 = vector.broadcast %16 : vector<64x1xf32> to vector<64x32xf32>
    %21 = arith.mulf %19, %20 : vector<64x32xf32>
    %22 = vector.broadcast %17 : vector<64x1xf32> to vector<64x32xf32>
    %23 = arith.addf %21, %22 : vector<64x32xf32>
    %c0_7 = arith.constant 0 : index
    %c0_8 = arith.constant 0 : index
    %24 = vector.load %arg3[%c0_7, %c0_8] : memref<64x32xf32, #tpu.memory_space<vmem>>, vector<64x32xf32>
    tpu.vector_store %arg3[%c0_7, %c0_8], %23 {strides = array<i32>} : memref<64x32xf32, #tpu.memory_space<vmem>>, vector<64x32xf32>,
    return
  }
  func.func @transform_0(%arg0: i32) -> (i32, i32) {
    %c0_i32 = arith.constant 0 : i32
    %c0_i32_0 = arith.constant 0 : i32
    return %c0_i32, %arg0 : i32, i32
  }
  func.func @transform_1(%arg0: i32) -> (i32, i32) {
    %c0_i32 = arith.constant 0 : i32
    %c0_i32_0 = arith.constant 0 : i32
    %c0_i32_1 = arith.constant 0 : i32
    return %c0_i32, %c0_i32_0 : i32, i32
  }
  func.func @transform_2(%arg0: i32) -> (i32, i32) {
    %c0_i32 = arith.constant 0 : i32
    %c0_i32_0 = arith.constant 0 : i32
    return %c0_i32, %arg0 : i32, i32
  }
}

</mosaic_0001>

<bundles_post_ra>
// kernel: tpu_custom_call.1
= control target key start
LH: loop header
LB: loop body
LE: loop exit
PB: predicated region body
PF: predicated region fallthrough
CT: control target
= control target key end

     0   :  { %v206_v0 = vmov 0   ;;  %vm19_vm0 = vcmask 261120   ;;  %v207_v27 = vmov 1   ;;  %s319_s1 = inlined_call_operand.vmem [shape: f32[64,2], index: 1, kind: input, shape index: {}]   ;;  %s320_s0 = inlined_call_operand.vmem [shape: f32[64,32], index: 0, kind: input, shape index: {}]   ;;  %s321_s2 = inlined_call_operand.vmem [shape: f32[64,32], index: 2, kind: output, shape index: {}]  }
   0x1   :  { %201 = vset.pattern.permute.xlu1 %v206_v0  ;;  %200 = vset.pattern.permute.xlu0 %v206_v0  ;;  %v84_v1 = vld [vmem:[%s319_s1 + $0x10] sm:$0xff]  ;;  %v82_v2 = vld [vmem:[%s319_s1] sm:$0xff]  ;;  %v85_v3 = vld [vmem:[%s319_s1 + $0x18] sm:$0xff] }
   0x2   :  { %110 = vperm.xlu1 %201, %v84_v1   ;;  %100 = vperm.xlu0 %200, %v82_v2   ;;  %v83_v4 = vld [vmem:[%s319_s1 + $0x8] sm:$0xff]  ;;  %v11_v5 = vld [vmem:[%s320_s0] sm:$0xff]  ;;  %v13_v7 = vld [vmem:[%s320_s0 + $0x10] sm:$0xff] }
   0x3   :  { %v12_v6 = vld [vmem:[%s320_s0 + $0x8] sm:$0xff]  ;;  %v14_v8 = vld [vmem:[%s320_s0 + $0x18] sm:$0xff]  ;;  %v20_v9 = vsel %vm19_vm0, %v11_v5, 0.0  ;;  %v23_v11 = vsel %vm19_vm0, %v13_v7, 0.0  ;;  %v86_v14 = vld [vmem:[%s319_s1 + $0x20] sm:$0xff] }
   0x4   :  { %v21_v10 = vsel %vm19_vm0, %v12_v6, 0.0  ;;  %v87_v13 = vld [vmem:[%s319_s1 + $0x28] sm:$0xff]  ;;  %v15_v15 = vld [vmem:[%s320_s0 + $0x20] sm:$0xff]  ;;  %v25_v16 = vsel %vm19_vm0, %v14_v8, 0.0  ;;  %v89_v20 = vld [vmem:[%s319_s1 + $0x38] sm:$0xff] }
   0x5   :  { %v22_v12 = vadd.f32 %v21_v10, %v20_v9  ;;  %v27_v19 = vsel %vm19_vm0, %v15_v15, 0.0  ;;  %v88_v21 = vld [vmem:[%s319_s1 + $0x30] sm:$0xff]  ;;  %v16_v22 = vld [vmem:[%s320_s0 + $0x28] sm:$0xff]  ;;  %v18_v29 = vld [vmem:[%s320_s0 + $0x38] sm:$0xff] }
   0x6   :  { %115 = vperm.xlu1 %201, %v85_v3   ;;  %105 = vperm.xlu0 %200, %v83_v4   ;;  %v29_v24 = vsel %vm19_vm0, %v16_v22, 0.0  ;;  %v17_v25 = vld [vmem:[%s320_s0 + $0x30] sm:$0xff]  ;;  %v33_v31 = vsel %vm19_vm0, %v18_v29, 0.0 }
   0x7   :  { %v24_v17 = vadd.f32 %v23_v11, %v22_v12  ;;  %v31_v28 = vsel %vm19_vm0, %v17_v25, 0.0 }
   0x9   :  { %v26_v18 = vadd.f32 %v25_v16, %v24_v17 }
   0xa   :  { %125 = vperm.xlu1 %201, %v87_v13   ;;  %120 = vperm.xlu0 %200, %v86_v14  }
   0xb   :  { %v28_v23 = vadd.f32 %v27_v19, %v26_v18 }
   0xd   :  { %v30_v26 = vadd.f32 %v29_v24, %v28_v23 }
   0xe   :  { %135 = vperm.xlu1 %201, %v89_v20   ;;  %130 = vperm.xlu0 %200, %v88_v21  }
   0xf   :  { %v32_v30 = vadd.f32 %v31_v28, %v30_v26 }
  0x11   :  { %v34_v32 = vadd.f32 %v33_v31, %v32_v30 }
  0x12   :  { %203 = vset.pattern.permute.xlu1 %v207_v27  ;;  %202 = vset.pattern.permute.xlu0 %v207_v27 }
  0x13   :  { %151 = vperm.xlu1 %203, %v83_v4   ;;  %147 = vperm.xlu0 %202, %v82_v2   ;;  %v35_v33 = vrot.slane %v34_v32, 4 }
  0x15   :  { %v36_v34 = vadd.f32 %v35_v33, %v34_v32 }
  0x17   :  { %155 = vperm.xlu1 %203, %v84_v1   ;;  %159 = vperm.xlu0 %202, %v85_v3   ;;  %v37_v35 = vrot.slane %v36_v34, 2 }
  0x19   :  { %v38_v36 = vadd.f32 %v37_v35, %v36_v34 }
  0x1b   :  { %163 = vperm.xlu1 %203, %v86_v14   ;;  %167 = vperm.xlu0 %202, %v87_v13   ;;  %v39_v37 = vrot.slane %v38_v36, 1 }
  0x1d   :  { %v40_v38 = vadd.f32 %v39_v37, %v38_v36 }
  0x1f   :  { %171 = vperm.xlu1 %203, %v88_v21   ;;  %175 = vperm.xlu0 %202, %v89_v20   ;;  %v41_v39 = vmul.f32 0.015625, %v40_v38 }
  0x21   :  { %v42_v40 = vsub.f32 %v11_v5, %v41_v39  ;;  %v43_v41 = vsub.f32 %v12_v6, %v41_v39  ;;  %v44_v42 = vsub.f32 %v13_v7, %v41_v39  ;;  %v45_v45 = vsub.f32 %v14_v8, %v41_v39 }
  0x22   :  { %v46_v50 = vsub.f32 %v15_v15, %v41_v39  ;;  %v47_v54 = vsub.f32 %v16_v22, %v41_v39  ;;  %v48_v58 = vsub.f32 %v17_v25, %v41_v39  ;;  %v49_v62 = vsub.f32 %v18_v29, %v41_v39 }
  0x23   :  { %v50_v43 = vmul.f32 %v42_v40, %v42_v40  ;;  %v51_v44 = vmul.f32 %v43_v41, %v43_v41  ;;  %v52_v46 = vmul.f32 %v44_v42, %v44_v42  ;;  %v53_v51 = vmul.f32 %v45_v45, %v45_v45 }
  0x24   :  { %v54_v55 = vmul.f32 %v46_v50, %v46_v50  ;;  %v55_v59 = vmul.f32 %v47_v54, %v47_v54  ;;  %v56_v63 = vmul.f32 %v48_v58, %v48_v58  ;;  %v57_v2 = vmul.f32 %v49_v62, %v49_v62 }
  0x25   :  { %v58_v47 = vsel %vm19_vm0, %v50_v43, 0.0  ;;  %v59_v48 = vsel %vm19_vm0, %v51_v44, 0.0  ;;  %v61_v52 = vsel %vm19_vm0, %v52_v46, 0.0  ;;  %v63_v56 = vsel %vm19_vm0, %v53_v51, 0.0 }
  0x26   :  { %v60_v49 = vadd.f32 %v59_v48, %v58_v47  ;;  %v65_v60 = vsel %vm19_vm0, %v54_v55, 0.0  ;;  %v67_v0 = vsel %vm19_vm0, %v55_v59, 0.0  ;;  %v69_v3 = vsel %vm19_vm0, %v56_v63, 0.0 }
  0x27   :  { %v71_v5 = vsel %vm19_vm0, %v57_v2, 0.0 }
  0x28   :  { %v62_v53 = vadd.f32 %v61_v52, %v60_v49 }
  0x2a   :  { %v64_v57 = vadd.f32 %v63_v56, %v62_v53 }
  0x2c   :  { %v66_v61 = vadd.f32 %v65_v60, %v64_v57 }
  0x2e   :  { %v68_v1 = vadd.f32 %v67_v0, %v66_v61 }
  0x30   :  { %v70_v4 = vadd.f32 %v69_v3, %v68_v1 }
  0x32   :  { %v72_v6 = vadd.f32 %v71_v5, %v70_v4 }
  0x34   :  { %v73_v7 = vrot.slane %v72_v6, 4 }
  0x36   :  { %v74_v8 = vadd.f32 %v73_v7, %v72_v6 }
  0x38   :  { %v75_v9 = vrot.slane %v74_v8, 2 }
  0x3a   :  { %v76_v10 = vadd.f32 %v75_v9, %v74_v8 }
  0x3c   :  { %v77_v11 = vrot.slane %v76_v10, 1 }
  0x3e   :  { %v78_v12 = vadd.f32 %v77_v11, %v76_v10 }
  0x40   :  { %v79_v13 = vmul.f32 0.015625, %v78_v12 }
  0x42   :  { %v80_v14 = vadd.f32 1e-05, %v79_v13 }
  0x44   :  { %204 = vrsqrt.f32 %v80_v14 }
  0x4e   :  { %v205_v21 = vpop.eup %204 }
  0x4f   :  { %v90_v22 = vmul.f32 %v205_v21, %v42_v40  ;;  %v91_v23 = vmul.f32 %v205_v21, %v43_v41  ;;  %v92_v26 = vmul.f32 %v205_v21, %v44_v42  ;;  %v93_v28 = vmul.f32 %v205_v21, %v45_v45 }
  0x50   :  { %v95_v36 = vmul.f32 %v205_v21, %v47_v54  ;;  %v94_v37 = vmul.f32 %v205_v21, %v46_v50  ;;  %v97_v44 = vmul.f32 %v205_v21, %v49_v62  ;;  %v96_v45 = vmul.f32 %v205_v21, %v48_v58 }
  0x81   :  { %v111_v15 = vpop.permute.xlu1 %110  ;;  %v101_v16 = vpop.permute.xlu0 %100 }
  0x82   :  { %v138_v27 = vmul.f32 %v101_v16, %v90_v22  ;;  %v140_v34 = vmul.f32 %v111_v15, %v92_v26 }
  0x85   :  { %v116_v17 = vpop.permute.xlu1 %115  ;;  %v106_v18 = vpop.permute.xlu0 %105 }
  0x86   :  { %v139_v29 = vmul.f32 %v106_v18, %v91_v23  ;;  %v141_v35 = vmul.f32 %v116_v17, %v93_v28 }
  0x89   :  { %v126_v19 = vpop.permute.xlu1 %125  ;;  %v121_v20 = vpop.permute.xlu0 %120 }
  0x8a   :  { %v143_v42 = vmul.f32 %v126_v19, %v95_v36  ;;  %v142_v43 = vmul.f32 %v121_v20, %v94_v37 }
  0x8d   :  { %v136_v24 = vpop.permute.xlu1 %135  ;;  %v131_v25 = vpop.permute.xlu0 %130 }
  0x8e   :  { %v145_v50 = vmul.f32 %v136_v24, %v97_v44  ;;  %v144_v51 = vmul.f32 %v131_v25, %v96_v45 }
  0x92   :  { %v152_v30 = vpop.permute.xlu1 %151  ;;  %v148_v31 = vpop.permute.xlu0 %147 }
  0x93   :  { %v179_v32 = vadd.f32 %v152_v30, %v139_v29  ;;  %v178_v33 = vadd.f32 %v148_v31, %v138_v27 }
  0x95   :  { %187 = vst.msk [vmem:[%s321_s2 + $0x8] sm:$0xff] %vm19_vm0, %v179_v32  ;;  %186 = vst.msk [vmem:[%s321_s2] sm:$0xff] %vm19_vm0, %v178_v33 }
  0x96   :  { %v156_v38 = vpop.permute.xlu1 %155  ;;  %v160_v39 = vpop.permute.xlu0 %159 }
  0x97   :  { %v180_v40 = vadd.f32 %v156_v38, %v140_v34  ;;  %v181_v41 = vadd.f32 %v160_v39, %v141_v35 }
  0x99   :  { %188 = vst.msk [vmem:[%s321_s2 + $0x10] sm:$0xff] %vm19_vm0, %v180_v40  ;;  %189 = vst.msk [vmem:[%s321_s2 + $0x18] sm:$0xff] %vm19_vm0, %v181_v41 }
  0x9a   :  { %v164_v46 = vpop.permute.xlu1 %163  ;;  %v168_v47 = vpop.permute.xlu0 %167 }
  0x9b   :  { %v182_v48 = vadd.f32 %v164_v46, %v142_v43  ;;  %v183_v49 = vadd.f32 %v168_v47, %v143_v42 }
  0x9d   :  { %190 = vst.msk [vmem:[%s321_s2 + $0x20] sm:$0xff] %vm19_vm0, %v182_v48  ;;  %191 = vst.msk [vmem:[%s321_s2 + $0x28] sm:$0xff] %vm19_vm0, %v183_v49 }
  0x9e   :  { %v172_v52 = vpop.permute.xlu1 %171  ;;  %v176_v53 = vpop.permute.xlu0 %175 }
  0x9f   :  { %v184_v54 = vadd.f32 %v172_v52, %v144_v51  ;;  %v185_v55 = vadd.f32 %v176_v53, %v145_v50 }
  0xa1   :  { %192 = vst.msk [vmem:[%s321_s2 + $0x30] sm:$0xff] %vm19_vm0, %v184_v54  ;;  %193 = vst.msk [vmem:[%s321_s2 + $0x38] sm:$0xff] %vm19_vm0, %v185_v55 }

</bundles_post_ra>
